<compile_context>
chip_gen: v7x
topology: tpu7x:2x2x1
jax: 0.10.0
libtpu: 0.0.40
codegen_flags: <defaults>
</compile_context>

<pallas_src>
import functools

import jax
import jax.numpy as jnp
from jax.experimental import pallas as pl
from jax.experimental.pallas import tpu as pltpu


def _round8_down(n):
    return max(8, (n // 8) * 8)


def _vmem_capacity_bytes():
    try:
        return int(pltpu.get_tpu_info().vmem_capacity_bytes)
    except Exception:
        return 64 << 20  # conservative fallback: v7x per-TensorCore VMEM


def _is_v5e():
    try:
        kind = jax.devices()[0].device_kind.lower()
    except Exception:
        return False
    return ("v5 lite" in kind) or ("v5e" in kind) or ("v5litepod" in kind)


def attention_kernel(x_ref, w1_ref, b1_ref, w2_ref, o_ref,
                     m_sc, l_sc, acc_sc, *, approx_recip):
    # x_ref : (BB, Tc, H)  input chunk (batch block i, T chunk t)
    # w1_ref: (H, H)       = W1^T, already in the matmul dtype (wrapper-side cast)
    # b1_ref: (1, H) f32   w2_ref: (1, H) f32
    # o_ref : (BB, H)      resident across the T-chunk grid axis
    # scratch (persists across the T axis): m (BB,1), l (BB,1), acc (BB,H), all f32
    BB, Tc, H = x_ref.shape
    t = pl.program_id(1)

    @pl.when(t == 0)
    def _init():
        m_sc[...] = jnp.full(m_sc.shape, -jnp.inf, m_sc.dtype)
        l_sc[...] = jnp.zeros(l_sc.shape, l_sc.dtype)
        acc_sc[...] = jnp.zeros(acc_sc.shape, acc_sc.dtype)

    x = x_ref[...]                                     # read the chunk once, reuse below

    # ---- Linear(H,H) + tanh: merge (BB, Tc) into the MXU M dimension ----------
    # (layout-preserving since Tc % 8 == 0)
    xm = x.reshape(BB * Tc, H).astype(w1_ref.dtype)
    h = jnp.tanh(
        jnp.dot(xm, w1_ref[...], preferred_element_type=jnp.float32) + b1_ref[...]
    )                                                  # (BB*Tc, H) f32

    # ---- Linear(H,1): VPU multiply + lane reduce (no MXU N=1 matmul) -----------
    # b2 omitted: softmax over T is shift-invariant, the bias cancels exactly.
    # Result is lane-dense: (BB, Tc) with the T chunk on lanes.
    e = jnp.sum(h.reshape(BB, Tc, H) * w2_ref[...], axis=-1)          # (BB, Tc)

    # ---- Online softmax over T (running max / denom / weighted sum) ------------
    m_prev = m_sc[...]                                                # (BB, 1)
    m_new = jnp.maximum(m_prev, jnp.max(e, axis=-1, keepdims=True))   # (BB, 1)
    corr = jnp.exp(m_prev - m_new)                                    # (BB, 1), 0 at t==0
    p = jnp.exp(e - m_new)                                            # (BB, Tc) lane-dense
    l_sc[...] = corr * l_sc[...] + jnp.sum(p, axis=-1, keepdims=True)
    # Relayout p -> (BB, Tc, 1) (one cheap XLU broadcast) for the weighted sum.
    acc_sc[...] = corr * acc_sc[...] + jnp.sum(x * p[:, :, None], axis=1)
    m_sc[...] = m_new

    @pl.when(t == pl.num_programs(1) - 1)
    def _finalize():
        # NOTE: with approx_recip=True, alpha sums to 1 only to ~1e-3 relative.
        inv_l = pl.reciprocal(l_sc[...], approx=approx_recip)
        o_ref[...] = (acc_sc[...] * inv_l).astype(o_ref.dtype)
        # TODO(synk): for production H < 128 the (BB, H) store lowers to masked
        # vst.msk; a lane-dense repacked output slab would avoid it (output bytes
        # are T-times smaller than input bytes, so this is low priority).


def _choose_tiles(B, T, H, x_itemsize, w_itemsize, block_b, block_t):
    """Pick (BB, Tc, vmem_limit): ~1-2 MiB x block per grid step, total kernel
    footprint inside ~60% of the per-core VMEM capacity (halved on v7x)."""
    vmem_cap = _vmem_capacity_bytes()
    budget = int(0.60 * vmem_cap)                      # ~77 MiB v5e/v6e, ~38 MiB v7x
    target = (2 << 20) if vmem_cap >= (96 << 20) else (1 << 20)

    # --- T chunk ---------------------------------------------------------------
    if block_t is not None:
        tc = int(block_t)
        assert T % tc == 0 and tc % 8 == 0, "block_t must divide T and be a multiple of 8"
    elif 8 * T * H * x_itemsize <= 2 * target:
        tc = T                                         # full sequence fits comfortably
    else:
        tc = 8                                         # largest mult-of-8 divisor under target
        max_d = min(T, max(8, target // (8 * H * x_itemsize)))
        for d in range(8, max_d + 1, 8):
            if T % d == 0:
                tc = d

    # --- batch block -----------------------------------------------------------
    b_ceil8 = -(-B // 8) * 8
    if block_b is not None:
        bb = max(8, (int(block_b) // 8) * 8)
    else:
        bb = max(8, int(target // (tc * H * x_itemsize)) // 8 * 8)
        if B >= 16:                                    # keep >= 2 batch steps (megacore/v7x)
            bb = min(bb, _round8_down(B // 2))
    bb = min(bb, b_ceil8)

    # --- degrade gracefully instead of a Mosaic VMEM OOM ------------------------
    def footprint(bb_):
        x_blk = bb_ * tc * H * x_itemsize              # one pipelined x block
        tmp = bb_ * tc * H * (2 + 4 + 4)               # bf16 xm + f32 h + f32 weighted product
        weights = 2 * (H * H * w_itemsize + 2 * H * 4)
        out_blk = 2 * bb_ * H * 4
        scratch = bb_ * (H + 2) * 4
        return 2 * x_blk + tmp + weights + out_blk + scratch + (2 << 20)

    while bb > 8 and footprint(bb) > budget:
        bb -= 8

    vmem_limit = int(min(budget, max(footprint(bb) + (4 << 20), 16 << 20)))
    return bb, tc, vmem_limit


def attention_forward(x, w1, b1, w2, b2, *, block_b=None, block_t=None,
                      matmul_dtype=None, approx_recip=True):
    """x: (B, T, H).  w1: (H, H) (out,in) and b1: (H,) of the first nn.Linear;
    w2: (1, H) of the second.  b2 is a mathematical no-op under the softmax over T
    and is ignored.  Returns (B, H) in x.dtype."""
    del b2  # shift-invariance of softmax over T
    B, T, H = x.shape
    assert T % 8 == 0, "T must be a multiple of 8 (sublane tile) for the merged-M reshape"

    if matmul_dtype is None:
        # v5e: HBM-bound with the MXU nearly idle -> bf16 cast only adds VPU pack work.
        matmul_dtype = jnp.float32 if _is_v5e() else jnp.bfloat16

    # One-time weight prep in the wrapper (no per-grid-step casts in the kernel).
    w1_t = w1.T.astype(matmul_dtype)                   # (H, H): x @ w1_t == x @ W1^T
    b1_r = b1.reshape(1, H).astype(jnp.float32)
    w2_r = w2.reshape(1, H).astype(jnp.float32)

    x_itemsize = jnp.dtype(x.dtype).itemsize
    w_itemsize = jnp.dtype(matmul_dtype).itemsize
    BB, Tc, vmem_limit = _choose_tiles(B, T, H, x_itemsize, w_itemsize, block_b, block_t)

    B_pad = -(-B // BB) * BB
    if B_pad != B:
        # Zero padding is safe: padded rows get a uniform softmax over equal energies
        # and a zero weighted sum; they are sliced away below.
        x = jnp.pad(x, ((0, B_pad - B), (0, 0), (0, 0)))

    kernel = functools.partial(attention_kernel, approx_recip=approx_recip)

    out = pl.pallas_call(
        kernel,
        out_shape=jax.ShapeDtypeStruct((B_pad, H), x.dtype),
        grid_spec=pltpu.PrefetchScalarGridSpec(
            num_scalar_prefetch=0,
            grid=(B_pad // BB, T // Tc),               # reduction (T) axis last
            in_specs=[
                pl.BlockSpec((BB, Tc, H), lambda i, t: (i, t, 0)),   # x chunk
                pl.BlockSpec((H, H), lambda i, t: (0, 0)),           # W1^T (grid-invariant)
                pl.BlockSpec((1, H), lambda i, t: (0, 0)),           # b1 row
                pl.BlockSpec((1, H), lambda i, t: (0, 0)),           # W2 row
            ],
            out_specs=pl.BlockSpec((BB, H), lambda i, t: (i, 0)),    # resident across T
            scratch_shapes=[
                pltpu.VMEM((BB, 1), jnp.float32),      # running max m
                pltpu.VMEM((BB, 1), jnp.float32),      # running denominator l
                pltpu.VMEM((BB, H), jnp.float32),      # running weighted sum
            ],
        ),
        compiler_params=pltpu.CompilerParams(
            dimension_semantics=("parallel", "arbitrary"),
            vmem_limit_bytes=vmem_limit,
        ),
    )(x, w1_t, b1_r, w2_r)

    return out[:B]


def attention_ref(x, w1, b1, w2, b2):
    """Pure-JAX reference matching the PyTorch forward exactly."""
    h = jnp.tanh(jnp.einsum("bth,oh->bto", x, w1) + b1)        # (B, T, H)
    e = jnp.einsum("bth,oh->bto", h, w2) + b2                  # (B, T, 1)
    alpha = jax.nn.softmax(e, axis=-2)                         # softmax over T
    return jnp.sum(x * alpha, axis=-2)                         # (B, H)


if __name__ == "__main__":
    def run_case(B, T, H, seed, **kw):
        key = jax.random.PRNGKey(seed)
        kx, kw1, kb1, kw2, kb2 = jax.random.split(key, 5)

        x = jax.random.normal(kx, (B, T, H), dtype=jnp.float32)

        # Deterministic PyTorch-style init: U(-1/sqrt(fan_in), 1/sqrt(fan_in))
        bound = 1.0 / jnp.sqrt(jnp.float32(H))
        w1 = jax.random.uniform(kw1, (H, H), jnp.float32, -bound, bound)  # (out, in)
        b1 = jax.random.uniform(kb1, (H,), jnp.float32, -bound, bound)
        w2 = jax.random.uniform(kw2, (1, H), jnp.float32, -bound, bound)  # (out=1, in=H)
        b2 = jax.random.uniform(kb2, (1,), jnp.float32, -bound, bound)

        ref = attention_ref(x, w1, b1, w2, b2)

        # Exact configuration (f32 MXU, exact reciprocal): tight check.
        out_exact = jax.block_until_ready(
            attention_forward(x, w1, b1, w2, b2,
                              matmul_dtype=jnp.float32, approx_recip=False, **kw))
        assert out_exact.shape == (B, H)
        assert jnp.allclose(out_exact, ref, atol=1e-4, rtol=1e-4), "f32 path mismatch"

        # Default perf configuration (chip-dependent matmul dtype, approx reciprocal).
        out_fast = jax.block_until_ready(attention_forward(x, w1, b1, w2, b2, **kw))
        assert out_fast.shape == (B, H)
        assert jnp.allclose(out_fast, ref, atol=5e-2, rtol=5e-2), "fast path mismatch"

    # Nominal small shapes implied by the module spec (batch padded to 8 internally).
    run_case(B=2, T=8, H=32, seed=0)
    # Auto-tiled multi-batch-block grid (exercises megacore sharding of the batch axis).
    run_case(B=32, T=16, H=64, seed=1)
    # Forced multi-chunk T axis: exercises the online-softmax accumulation path.
    run_case(B=16, T=32, H=64, seed=2, block_t=8)

    print("KERNEL_OK")
</pallas_src>

<mosaic_0001>
module attributes {stable_mosaic.version = 11 : i64} {
  func.func @attention_kernel(%arg0: i32, %arg1: i32, %arg2: memref<8x8x32xf32, #tpu.memory_space<vmem>>, %arg3: memref<32x32xf32, #tpu.memory_space<vmem>>, %arg4: memref<1x32xf32, #tpu.memory_space<vmem>>, %arg5: memref<1x32xf32, #tpu.memory_space<vmem>>, %arg6: memref<8x32xf32, #tpu.memory_space<vmem>>, %arg7: memref<8x1xf32, #tpu.memory_space<vmem>>, %arg8: memref<8x1xf32, #tpu.memory_space<vmem>>, %arg9: memref<8x32xf32, #tpu.memory_space<vmem>>) attributes {dimension_semantics = [#tpu.dimension_semantics<parallel>, #tpu.dimension_semantics<arbitrary>], iteration_bounds = array<i64: 1, 1>, scalar_prefetch = 0 : i64, scratch_operands = 3 : i64, tpu.core_type = #tpu.core_type<tc>, window_params = [{transform_indices = @transform_0, window_bounds = array<i64: 8, 8, 32>}, {pipeline_mode = #tpu.pipeline_mode<synchronous>, transform_indices = @transform_1, window_bounds = array<i64: 32, 32>}, {pipeline_mode = #tpu.pipeline_mode<synchronous>, transform_indices = @transform_2, window_bounds = array<i64: 1, 32>}, {pipeline_mode = #tpu.pipeline_mode<synchronous>, transform_indices = @transform_3, window_bounds = array<i64: 1, 32>}, {transform_indices = @transform_4, window_bounds = array<i64: 8, 32>}]} {
    %c0_i32 = arith.constant 0 : i32
    %0 = arith.cmpi eq, %arg1, %c0_i32 : i32
    %1 = arith.extui %0 : i1 to i32
    %c0_i32_0 = arith.constant 0 : i32
    %2 = arith.cmpi ne, %1, %c0_i32_0 : i32
    scf.if %2 {
      %cst_27 = arith.constant 0xFF800000 : f32
      %45 = vector.broadcast %cst_27 : f32 to vector<8x1xf32>
      %c0_28 = arith.constant 0 : index
      %c0_29 = arith.constant 0 : index
      %46 = vector.load %arg7[%c0_28, %c0_29] : memref<8x1xf32, #tpu.memory_space<vmem>>, vector<8x1xf32>
      tpu.vector_store %arg7[%c0_28, %c0_29], %45 {strides = array<i32>} : memref<8x1xf32, #tpu.memory_space<vmem>>, vector<8x1xf32>,
      %cst_30 = arith.constant 0.000000e+00 : f32
      %47 = vector.broadcast %cst_30 : f32 to vector<8x1xf32>
      %c0_31 = arith.constant 0 : index
      %c0_32 = arith.constant 0 : index
      %48 = vector.load %arg8[%c0_31, %c0_32] : memref<8x1xf32, #tpu.memory_space<vmem>>, vector<8x1xf32>
      tpu.vector_store %arg8[%c0_31, %c0_32], %47 {strides = array<i32>} : memref<8x1xf32, #tpu.memory_space<vmem>>, vector<8x1xf32>,
      %cst_33 = arith.constant 0.000000e+00 : f32
      %49 = vector.broadcast %cst_33 : f32 to vector<8x32xf32>
      %c0_34 = arith.constant 0 : index
      %c0_35 = arith.constant 0 : index
      %50 = vector.load %arg9[%c0_34, %c0_35] : memref<8x32xf32, #tpu.memory_space<vmem>>, vector<8x32xf32>
      tpu.vector_store %arg9[%c0_34, %c0_35], %49 {strides = array<i32>} : memref<8x32xf32, #tpu.memory_space<vmem>>, vector<8x32xf32>,
    } else {
    }
    %c0 = arith.constant 0 : index
    %c0_1 = arith.constant 0 : index
    %c0_2 = arith.constant 0 : index
    %3 = vector.load %arg2[%c0, %c0_1, %c0_2] : memref<8x8x32xf32, #tpu.memory_space<vmem>>, vector<8x8x32xf32>
    %4 = vector.shape_cast %3 : vector<8x8x32xf32> to vector<64x32xf32>
    %c0_3 = arith.constant 0 : index
    %c0_4 = arith.constant 0 : index
    %5 = vector.load %arg3[%c0_3, %c0_4] : memref<32x32xf32, #tpu.memory_space<vmem>>, vector<32x32xf32>
    %cst = arith.constant dense<0.000000e+00> : vector<64x32xf32>
    %6 = tpu.matmul %4, %5, %cst {dimension_numbers = #tpu.dot_dimension_numbers<[1], [0], [0], [1], [0, 0, 1, 1], [], []>} : vector<64x32xf32>, vector<32x32xf32>, vector<64x32xf32> -> vector<64x32xf32>
    %c0_5 = arith.constant 0 : index
    %c0_6 = arith.constant 0 : index
    %7 = vector.load %arg4[%c0_5, %c0_6] : memref<1x32xf32, #tpu.memory_space<vmem>>, vector<1x32xf32>
    %8 = vector.broadcast %7 : vector<1x32xf32> to vector<64x32xf32>
    %9 = arith.addf %6, %8 : vector<64x32xf32>
    %10 = math.tanh %9 : vector<64x32xf32>
    %11 = vector.shape_cast %10 : vector<64x32xf32> to vector<8x8x32xf32>
    %c0_7 = arith.constant 0 : index
    %c0_8 = arith.constant 0 : index
    %12 = vector.load %arg5[%c0_7, %c0_8] : memref<1x32xf32, #tpu.memory_space<vmem>>, vector<1x32xf32>
    %13 = vector.shape_cast %12 : vector<1x32xf32> to vector<1x1x32xf32>
    %14 = vector.broadcast %13 : vector<1x1x32xf32> to vector<8x8x32xf32>
    %15 = arith.mulf %11, %14 : vector<8x8x32xf32>
    %cst_9 = arith.constant dense<0.000000e+00> : vector<8x8xf32>
    %16 = vector.multi_reduction <add>, %15, %cst_9 [2] : vector<8x8x32xf32> to vector<8x8xf32>
    %c0_10 = arith.constant 0 : index
    %c0_11 = arith.constant 0 : index
    %17 = vector.load %arg7[%c0_10, %c0_11] : memref<8x1xf32, #tpu.memory_space<vmem>>, vector<8x1xf32>
    %cst_12 = arith.constant dense<0xFF800000> : vector<8xf32>
    %18 = vector.multi_reduction <maximumf>, %16, %cst_12 [1] : vector<8x8xf32> to vector<8xf32>
    %19 = vector.shape_cast %18 : vector<8xf32> to vector<8x1xf32>
    %20 = arith.maximumf %17, %19 : vector<8x1xf32>
    %21 = arith.subf %17, %20 : vector<8x1xf32>
    %22 = math.exp %21 : vector<8x1xf32>
    %23 = vector.broadcast %20 : vector<8x1xf32> to vector<8x8xf32>
    %24 = arith.subf %16, %23 : vector<8x8xf32>
    %25 = math.exp %24 : vector<8x8xf32>
    %c0_13 = arith.constant 0 : index
    %c0_14 = arith.constant 0 : index
    %26 = vector.load %arg8[%c0_13, %c0_14] : memref<8x1xf32, #tpu.memory_space<vmem>>, vector<8x1xf32>
    %27 = arith.mulf %22, %26 : vector<8x1xf32>
    %cst_15 = arith.constant dense<0.000000e+00> : vector<8xf32>
    %28 = vector.multi_reduction <add>, %25, %cst_15 [1] : vector<8x8xf32> to vector<8xf32>
    %29 = vector.shape_cast %28 : vector<8xf32> to vector<8x1xf32>
    %30 = arith.addf %27, %29 : vector<8x1xf32>
    %c0_16 = arith.constant 0 : index
    %c0_17 = arith.constant 0 : index
    %31 = vector.load %arg8[%c0_16, %c0_17] : memref<8x1xf32, #tpu.memory_space<vmem>>, vector<8x1xf32>
    tpu.vector_store %arg8[%c0_16, %c0_17], %30 {strides = array<i32>} : memref<8x1xf32, #tpu.memory_space<vmem>>, vector<8x1xf32>,
    %c0_18 = arith.constant 0 : index
    %c0_19 = arith.constant 0 : index
    %32 = vector.load %arg9[%c0_18, %c0_19] : memref<8x32xf32, #tpu.memory_space<vmem>>, vector<8x32xf32>
    %33 = vector.broadcast %22 : vector<8x1xf32> to vector<8x32xf32>
    %34 = arith.mulf %33, %32 : vector<8x32xf32>
    %35 = vector.shape_cast %25 : vector<8x8xf32> to vector<8x8x1xf32>
    %36 = vector.broadcast %35 : vector<8x8x1xf32> to vector<8x8x32xf32>
    %37 = arith.mulf %3, %36 : vector<8x8x32xf32>
    %cst_20 = arith.constant dense<0.000000e+00> : vector<8x32xf32>
    %38 = vector.multi_reduction <add>, %37, %cst_20 [1] : vector<8x8x32xf32> to vector<8x32xf32>
    %39 = arith.addf %34, %38 : vector<8x32xf32>
    %c0_21 = arith.constant 0 : index
    %c0_22 = arith.constant 0 : index
    %40 = vector.load %arg9[%c0_21, %c0_22] : memref<8x32xf32, #tpu.memory_space<vmem>>, vector<8x32xf32>
    tpu.vector_store %arg9[%c0_21, %c0_22], %39 {strides = array<i32>} : memref<8x32xf32, #tpu.memory_space<vmem>>, vector<8x32xf32>,
    %c0_23 = arith.constant 0 : index
    %c0_24 = arith.constant 0 : index
    %41 = vector.load %arg7[%c0_23, %c0_24] : memref<8x1xf32, #tpu.memory_space<vmem>>, vector<8x1xf32>
    tpu.vector_store %arg7[%c0_23, %c0_24], %20 {strides = array<i32>} : memref<8x1xf32, #tpu.memory_space<vmem>>, vector<8x1xf32>,
    %c0_i32_25 = arith.constant 0 : i32
    %42 = arith.cmpi eq, %arg1, %c0_i32_25 : i32
    %43 = arith.extui %42 : i1 to i32
    %c0_i32_26 = arith.constant 0 : i32
    %44 = arith.cmpi ne, %43, %c0_i32_26 : i32
    scf.if %44 {
      %c0_27 = arith.constant 0 : index
      %c0_28 = arith.constant 0 : index
      %45 = vector.load %arg8[%c0_27, %c0_28] : memref<8x1xf32, #tpu.memory_space<vmem>>, vector<8x1xf32>
      %46 = tpu.reciprocal %45 : vector<8x1xf32> -> vector<8x1xf32>
      %c0_29 = arith.constant 0 : index
      %c0_30 = arith.constant 0 : index
      %47 = vector.load %arg9[%c0_29, %c0_30] : memref<8x32xf32, #tpu.memory_space<vmem>>, vector<8x32xf32>
      %48 = vector.broadcast %46 : vector<8x1xf32> to vector<8x32xf32>
      %49 = arith.mulf %47, %48 : vector<8x32xf32>
      %c0_31 = arith.constant 0 : index
      %c0_32 = arith.constant 0 : index
      %50 = vector.load %arg6[%c0_31, %c0_32] : memref<8x32xf32, #tpu.memory_space<vmem>>, vector<8x32xf32>
      tpu.vector_store %arg6[%c0_31, %c0_32], %49 {strides = array<i32>} : memref<8x32xf32, #tpu.memory_space<vmem>>, vector<8x32xf32>,
    } else {
    }
    return
  }
  func.func @transform_0(%arg0: i32, %arg1: i32) -> (i32, i32, i32) {
    %c0_i32 = arith.constant 0 : i32
    %c0_i32_0 = arith.constant 0 : i32
    return %arg0, %arg1, %c0_i32 : i32, i32, i32
  }
  func.func @transform_1(%arg0: i32, %arg1: i32) -> (i32, i32) {
    %c0_i32 = arith.constant 0 : i32
    %c0_i32_0 = arith.constant 0 : i32
    %c0_i32_1 = arith.constant 0 : i32
    return %c0_i32, %c0_i32_0 : i32, i32
  }
  func.func @transform_2(%arg0: i32, %arg1: i32) -> (i32, i32) {
    %c0_i32 = arith.constant 0 : i32
    %c0_i32_0 = arith.constant 0 : i32
    %c0_i32_1 = arith.constant 0 : i32
    return %c0_i32, %c0_i32_0 : i32, i32
  }
  func.func @transform_3(%arg0: i32, %arg1: i32) -> (i32, i32) {
    %c0_i32 = arith.constant 0 : i32
    %c0_i32_0 = arith.constant 0 : i32
    %c0_i32_1 = arith.constant 0 : i32
    return %c0_i32, %c0_i32_0 : i32, i32
  }
  func.func @transform_4(%arg0: i32, %arg1: i32) -> (i32, i32) {
    %c0_i32 = arith.constant 0 : i32
    %c0_i32_0 = arith.constant 0 : i32
    return %arg0, %c0_i32 : i32, i32
  }
}

</mosaic_0001>

<bundles_post_ra>
// kernel: tpu_custom_call.1
= control target key start
LH: loop header
LB: loop body
LE: loop exit
PB: predicated region body
PF: predicated region fallthrough
CT: control target
= control target key end

     0   :  { %9 = vsyncpa [#allocation6], 0  ;;  %s978_s0 = inlined_call_operand.hbm [shape: f32[8,8,32], index: 0, kind: input, shape index: {}]   ;;  %s979_s1 = inlined_call_operand.hbm [shape: f32[32,32], index: 1, kind: input, shape index: {}]   ;;  %s980_s2 = inlined_call_operand.vmem [shape: f32[1,32], index: 2, kind: input, shape index: {}]   ;;  %s981_s3 = inlined_call_operand.vmem [shape: f32[1,32], index: 3, kind: input, shape index: {}]   ;;  %s982_s4 = inlined_call_operand.hbm [shape: f32[8,32], index: 4, kind: output, shape index: {}]  }
   0x1   :  { %10 = vsyncpa [#allocation9], 0 }
   0x2   :  { %11 = vsyncpa [#allocation7], 0  ;;  %s764_s15 = smov [#allocation5]   ;;  %s692_s19 = scalar_lea.hbm %s978_s0, 1024 }
   0x3   :  { %s17_s16 = sshll.u32 %s764_s15, 4  ;;  %p693_p0 = scmp.ne.s32.totalorder %s978_s0, %s692_s19  ;;  %s18_s16 = int_to_ptr.vmem [resolvable:$true] %s17_s16 }
   0x4   :  { %p696_p1 = scmp.lt.u32.totalorder %s692_s19, %s978_s0 }
   0x6   :  { %p698_p2 = pnand %p696_p1, %p693_p0 }
   0x8   :  { %701 = shalt.err (!%p698_p2)
}
   0x9   :  { %s702_s24 = scalar_lea.vmem %s18_s16, 1024  ;;  %p707_p4 = scmp.lt.s32.totalorder %s18_s16, %s18_s16 }
   0xa   :  { %p703_p3 = scmp.ne.s32.totalorder %s18_s16, %s702_s24  ;;  %p708_p5 = scmp.lt.s32.totalorder %s702_s24, %s702_s24 }
   0xc   :  { %p709_p6 = por %p708_p5, %p707_p4 }
   0xe   :  { %p710_p7 = pnand %p709_p6, %p703_p3 }
  0x10   :  { %713 = shalt.err (!%p710_p7)
}
  0x11   :  { %s765_s25 = smov 128   ;;  %s766_s26 = smov 8  }
  0x12   :  { %23 = dma.hbm_to_vmem [thread:$0]  %s978_s0, 1024, %s18_s16, [#allocation6], %s765_s25, %s765_s25, %s766_s26  }
  0x13   :  { %s767_s29 = smov [#allocation8]   ;;  %s714_s7 = scalar_lea.hbm %s979_s1, 512 }
  0x14   :  { %s29_s30 = sshll.u32 %s767_s29, 4  ;;  %p715_p8 = scmp.ne.s32.totalorder %s979_s1, %s714_s7  ;;  %s30_s30 = int_to_ptr.vmem [resolvable:$true] %s29_s30 }
  0x15   :  { %p718_p9 = scmp.lt.u32.totalorder %s714_s7, %s979_s1 }
  0x17   :  { %p720_p10 = pnand %p718_p9, %p715_p8 }
  0x19   :  { %723 = shalt.err (!%p720_p10)
}
  0x1a   :  { %s724_s12 = scalar_lea.vmem %s30_s30, 512  ;;  %p729_p12 = scmp.lt.s32.totalorder %s30_s30, %s30_s30 }
  0x1b   :  { %p725_p11 = scmp.ne.s32.totalorder %s30_s30, %s724_s12  ;;  %p730_p13 = scmp.lt.s32.totalorder %s724_s12, %s724_s12 }
  0x1d   :  { %p731_p0 = por %p730_p13, %p729_p12 }
  0x1f   :  { %p732_p1 = pnand %p731_p0, %p725_p11 }
  0x21   :  { %735 = shalt.err (!%p732_p1)
}
  0x22   :  { %35 = dma.hbm_to_vmem [thread:$0]  %s979_s1, 512, %s30_s30, [#allocation9], %s765_s25, %s765_s25, %s766_s26  }
  0x23   :  { %758 = dma.done.wait [#allocation6], 1024  }
  0x24   :  { %759 = vsyncadd [#allocation6], 4294966272 }
  0x25   :  { %760 = dma.done.wait [#allocation9], 512  }
  0x26   :  { %761 = vsyncadd [#allocation9], 4294966784  ;;  %vm53_vm0 = vcmask 261120   ;;  %v63_v0 = vld [vmem:[#allocation8] sm:$0xff]  ;;  %v64_v1 = vld [vmem:[#allocation8 + $0x8] sm:$0xff]  ;;  %vm50_vm1 = vcmask 7168   ;;  %v260_v57 = vlaneseq }
  0x27   :  { %v65_v2 = vld [vmem:[#allocation8 + $0x10] sm:$0xff]  ;;  %v634_v3 = vpack.c.bf16 %v64_v1, %v63_v0  ;;  %v66_v4 = vld [vmem:[#allocation8 + $0x18] sm:$0xff]  ;;  %v821_v5 = vld [vmem:[#allocation5] sm:$0xff]  ;;  %v768_v56 = vmov -inf   ;;  %vm294_vm2 = vcmask 1041409   ;;  %vm296_vm3 = vcmask 1042434  }
  0x28   :  { %v638_v6 = vpack.c.bf16 %v66_v4, %v65_v2  ;;  %622 = vmatprep.mubr.msk.f32.mxu0 %vm53_vm0, %v821_v5  ;;  %v825_v7 = vld [vmem:[#allocation5 + $0x20] sm:$0xff]  ;;  %v829_v8 = vld [vmem:[#allocation5 + $0x8] sm:$0xff]  ;;  %v833_v10 = vld [vmem:[#allocation5 + $0x10] sm:$0xff]  ;;  %51 = vst.msk [vmem:[#allocation2] sm:$0xff] %vm50_vm1, %v768_v56  ;;  %v261_v58 = vand.u32 127, %v260_v57  ;;  %v868_v59 = vshrl.u32 %v260_v57, 7 }
  0x29   :  { %635 = vmatprep.subr.bf16.mxu0 %v634_v3  ;;  %642 = vmatprep.subr.bf16.mxu1 %v634_v3  ;;  %v831_v9 = vld [vmem:[#allocation5 + $0x28] sm:$0xff]  ;;  %v835_v11 = vld [vmem:[#allocation5 + $0x30] sm:$0xff]  ;;  %v843_v12 = vld [vmem:[#allocation5 + $0x18] sm:$0xff]  ;;  %vm298_vm4 = vcmask 1043459   ;;  %vm300_vm5 = vcmask 1044484   ;;  %vm302_vm6 = vcmask 1045509  }
  0x2a   :  { %637 = vmatpush3.bf16.msra.mxu0 %v634_v3  ;;  %644 = vmatpush3.bf16.msra.mxu1 %v634_v3  ;;  %v847_v13 = vld [vmem:[#allocation5 + $0x38] sm:$0xff]  ;;  %v592_v14 = vld [vmem:[%s980_s2] ss:$0 sm:$0xff]  ;;  %v871_v61 = vsub.s32 %v261_v58, %v868_v59  ;;  %vm304_vm7 = vcmask 1046534   ;;  %vm306_vm8 = vcmask 1047559   ;;  %vm309_vm9 = vcmask 64512  }
  0x2b   :  { %639 = vmatprep.subr.bf16.mxu0 %v638_v6  ;;  %643 = vmatprep.subr.bf16.mxu1 %v638_v6  ;;  %v601_v31 = vld [vmem:[%s981_s3] ss:$0 sm:$0xff]  ;;  %s771_s3 = smov [#allocation10]  }
  0x2c   :  { %628 = vmatprep.mubr.msk.f32.mxu1 %vm53_vm0, %v825_v7  ;;  %s582_s16 = sshll.u32 %s771_s3, 4  ;;  %s583_s16 = int_to_ptr.vmem [resolvable:$true] %s582_s16 }
  0x2d   :  { %s736_s17 = scalar_lea.vmem %s583_s16, 128  ;;  %p741_p3 = scmp.lt.s32.totalorder %s583_s16, %s583_s16 }
  0x2e   :  { %641 = vmatpush3.bf16.msra.mxu0 %v638_v6  ;;  %645 = vmatpush3.bf16.msra.mxu1 %v638_v6  ;;  %p737_p2 = scmp.ne.s32.totalorder %s583_s16, %s736_s17  ;;  %p742_p4 = scmp.lt.s32.totalorder %s736_s17, %s736_s17 }
  0x30   :  { %p743_p5 = por %p742_p4, %p741_p3 }
  0x31   :  { %623 = vmatmul.mubr.msk.f32.vlgmr.msra.gmra.mrb[0].mxu0 %vm53_vm0, %v829_v8  ;;  %629 = vmatmul.mubr.msk.f32.vlgmr.msra.gmra.mrb[0].mxu1 %vm53_vm0, %v831_v9 }
  0x32   :  { %625 = vmatprep.mubr.msk.f32.mxu0 %vm53_vm0, %v833_v10  ;;  %631 = vmatprep.mubr.msk.f32.mxu1 %vm53_vm0, %v835_v11  ;;  %p744_p6 = pnand %p743_p5, %p737_p2 }
  0x35   :  { %626 = vmatmul.mubr.msk.f32.gmra.mrb[2].mxu0 %vm53_vm0, %v843_v12  ;;  %632 = vmatmul.mubr.msk.f32.gmra.mrb[2].mxu1 %vm53_vm0, %v847_v13 }
 0x104   :  { %v624_v15 = vpop.f32.mrb[0].mxu0  ;;  %v630_v16 = vpop.f32.mrb[0].mxu1 }
 0x105   :  { %v171_v17 = vadd.f32 %v624_v15, %v592_v14  ;;  %v165_v18 = vpop.f32.mrb[1].mxu0  ;;  %v185_v19 = vpop.f32.mrb[1].mxu1  ;;  %v191_v29 = vadd.f32 %v630_v16, %v592_v14 }
 0x106   :  { %v166_v20 = vadd.f32 %v592_v14, %v165_v18  ;;  %v186_v21 = vadd.f32 %v592_v14, %v185_v19 }
 0x107   :  { %656 = vtanh.f32 %v171_v17 }
 0x108   :  { %658 = vtanh.f32 %v166_v20  ;;  %v627_v22 = vpop.f32.mrb[2].mxu0  ;;  %v633_v23 = vpop.f32.mrb[2].mxu1 }
 0x109   :  { %v181_v24 = vadd.f32 %v627_v22, %v592_v14  ;;  %v175_v25 = vpop.f32.mrb[3].mxu0  ;;  %v195_v26 = vpop.f32.mrb[3].mxu1  ;;  %660 = vtanh.f32 %v186_v21  ;;  %v201_v30 = vadd.f32 %v633_v23, %v592_v14 }
 0x10a   :  { %v176_v27 = vadd.f32 %v592_v14, %v175_v25  ;;  %v196_v28 = vadd.f32 %v592_v14, %v195_v26 }
 0x10b   :  { %662 = vtanh.f32 %v181_v24 }
 0x10c   :  { %664 = vtanh.f32 %v176_v27 }
 0x10d   :  { %666 = vtanh.f32 %v196_v28 }
 0x10e   :  { %668 = vtanh.f32 %v191_v29  ;;  %v769_v29 = vmov 0  }
 0x10f   :  { %670 = vtanh.f32 %v201_v30  ;;  %654 = vset.pattern.permute.xlu1 %v769_v29  ;;  %655 = vset.pattern.permute.xlu0 %v769_v29  ;;  %v770_v30 = vmov 0.0  }
 0x110   :  { %54 = vst.msk [vmem:[#allocation4] sm:$0xff] %vm53_vm0, %v770_v30 }
 0x111   :  { %v657_v32 = vpop.eup %656  ;;  %52 = vst.msk [vmem:[#allocation3] sm:$0xff] %vm50_vm1, %v770_v30 }
 0x112   :  { %v659_v33 = vpop.eup %658  ;;  %v220_v34 = vmul.f32 %v657_v32, %v601_v31 }
 0x113   :  { %v661_v35 = vpop.eup %660  ;;  %v219_v37 = vmul.f32 %v659_v33, %v601_v31 }
 0x114   :  { %v230_v36 = vsel %vm53_vm0, %v220_v34, 0.0  ;;  %v223_v41 = vmul.f32 %v661_v35, %v601_v31  ;;  %v323_v35 = vsub.s32 0, %v868_v59 }
 0x115   :  { %v663_v38 = vpop.eup %662  ;;  %231 = vadd.xlane.f32.xlu0 %v230_v36  ;;  %v227_v44 = vsel %vm53_vm0, %v219_v37, 0.0  ;;  %v327_v36 = vsub.s32 1, %v868_v59  ;;  %v331_v37 = vsub.s32 2, %v868_v59 }
 0x116   :  { %v665_v39 = vpop.eup %664  ;;  %v222_v40 = vmul.f32 %v663_v38, %v601_v31  ;;  %v239_v47 = vsel %vm53_vm0, %v223_v41, 0.0  ;;  %v335_v38 = vsub.s32 3, %v868_v59 }
 0x117   :  { %v667_v42 = vpop.eup %666  ;;  %v221_v45 = vmul.f32 %v665_v39, %v601_v31 }
 0x118   :  { %v236_v43 = vsel %vm53_vm0, %v222_v40, 0.0  ;;  %v669_v46 = vpop.eup %668  ;;  %v225_v48 = vmul.f32 %v667_v42, %v601_v31 }
 0x119   :  { %237 = vadd.xlane.f32.xlu1 %v236_v43  ;;  %228 = vadd.xlane.f32.xlu0 %v227_v44  ;;  %v233_v49 = vsel %vm53_vm0, %v221_v45, 0.0  ;;  %v224_v50 = vmul.f32 %v669_v46, %v601_v31  ;;  %v671_v51 = vpop.eup %670  ;;  %v339_v45 = vsub.s32 4, %v868_v59 }
 0x11a   :  { %v245_v52 = vsel %vm53_vm0, %v225_v48, 0.0  ;;  %v226_v54 = vmul.f32 %v671_v51, %v601_v31  ;;  %v251_v31 = vld [vmem:[#allocation2] sm:$0xff]  ;;  %v343_v51 = vsub.s32 5, %v868_v59 }
 0x11b   :  { %v242_v53 = vsel %vm53_vm0, %v224_v50, 0.0 }
 0x11c   :  { %v248_v55 = vsel %vm53_vm0, %v226_v54, 0.0 }
 0x11d   :  { %234 = vadd.xlane.f32.xlu1 %v233_v49  ;;  %240 = vadd.xlane.f32.xlu0 %v239_v47 }
 0x121   :  { %243 = vadd.xlane.f32.xlu1 %v242_v53  ;;  %246 = vadd.xlane.f32.xlu0 %v245_v52 }
 0x125   :  { %249 = vadd.xlane.f32.xlu1 %v248_v55  ;;  %v347_v55 = vsub.s32 6, %v868_v59 }
 0x1a2   :  { %v232_v60 = vpop.xlane.xlu0 %231 }
 0x1a3   :  { %v269_v1 = vrot.slane %v232_v60, %v871_v61 }
 0x1a6   :  { %v873_v62 = vpop.xlane.xlu1 %237  ;;  %v229_v63 = vpop.xlane.xlu0 %228 }
 0x1a7   :  { %v265_v0 = vrot.slane %v229_v63, %v871_v61  ;;  %v277_v14 = vrot.slane %v873_v62, %v871_v61 }
 0x1a9   :  { %v295_v15 = vsel %vm294_vm2, %v269_v1, %v265_v0 }
 0x1aa   :  { %v235_v2 = vpop.xlane.xlu1 %234  ;;  %v877_v3 = vpop.xlane.xlu0 %240 }
 0x1ab   :  { %v273_v4 = vrot.slane %v235_v2, %v871_v61  ;;  %v281_v6 = vrot.slane %v877_v3, %v871_v61 }
 0x1ad   :  { %v297_v16 = vsel %vm296_vm3, %v273_v4, %v295_v15 }
 0x1ae   :  { %v299_v17 = vsel %vm298_vm4, %v277_v14, %v297_v16  ;;  %v887_v18 = vpop.xlane.xlu1 %243  ;;  %v889_v19 = vpop.xlane.xlu0 %246 }
 0x1af   :  { %v301_v20 = vsel %vm300_vm5, %v281_v6, %v299_v17  ;;  %v285_v21 = vrot.slane %v887_v18, %v871_v61  ;;  %v289_v22 = vrot.slane %v889_v19, %v871_v61 }
 0x1b1   :  { %v303_v23 = vsel %vm302_vm6, %v285_v21, %v301_v20 }
 0x1b2   :  { %v897_v24 = vpop.xlane.xlu1 %249  ;;  %v305_v26 = vsel %vm304_vm7, %v289_v22, %v303_v23 }
 0x1b3   :  { %v293_v25 = vrot.slane %v897_v24, %v871_v61 }
 0x1b5   :  { %v307_v27 = vsel %vm306_vm8, %v293_v25, %v305_v26 }
 0x1b6   :  { %v310_v28 = vsel %vm309_vm9, %v307_v27, -inf }
 0x1b7   :  { %311 = vmax.xlane.f32.xlu0 %v310_v28 }
 0x244   :  { %v312_v32 = vpop.xlane.xlu0 %311 }
 0x245   :  { %v313_v33 = vmax.f32 %v251_v31, %v312_v32 }
 0x247   :  { %v314_v34 = vsub.f32 %v251_v31, %v313_v33  ;;  %562 = vst.msk [vmem:[#allocation2] sm:$0xff] %vm50_vm1, %v313_v33  ;;  %319 = vperm.xlu1 %654, %v313_v33  }
 0x249   :  { %v315_v50 = vmul.f32 1.442695, %v314_v34 }
 0x2c6   :  { %v320_v39 = vpop.permute.xlu1 %319 }
 0x2c7   :  { %v324_v40 = vrot.slane %v320_v39, %v323_v35  ;;  %v328_v41 = vrot.slane %v320_v39, %v327_v36  ;;  %v332_v42 = vrot.slane %v320_v39, %v331_v37  ;;  %v336_v46 = vrot.slane %v320_v39, %v335_v38 }
 0x2c8   :  { %v340_v52 = vrot.slane %v320_v39, %v339_v45  ;;  %v344_v56 = vrot.slane %v320_v39, %v343_v51 }
 0x2c9   :  { %v361_v43 = vsub.f32 %v229_v63, %v324_v40  ;;  %v362_v44 = vsub.f32 %v232_v60, %v328_v41  ;;  %v363_v47 = vsub.f32 %v235_v2, %v332_v42  ;;  %v364_v53 = vsub.f32 %v873_v62, %v336_v46 }
 0x2ca   :  { %v365_v57 = vsub.f32 %v877_v3, %v340_v52  ;;  %v351_v60 = vsub.s32 7, %v868_v59  ;;  %v348_v63 = vrot.slane %v320_v39, %v347_v55  ;;  %v366_v0 = vsub.f32 %v887_v18, %v344_v56 }
 0x2cb   :  { %v369_v48 = vmul.f32 1.442695, %v361_v43  ;;  %v371_v49 = vmul.f32 1.442695, %v362_v44  ;;  %v373_v54 = vmul.f32 1.442695, %v363_v47 }
 0x2cc   :  { %v375_v58 = vmul.f32 1.442695, %v364_v53  ;;  %v377_v1 = vmul.f32 1.442695, %v365_v57  ;;  %v352_v62 = vrot.slane %v320_v39, %v351_v60  ;;  %v367_v6 = vsub.f32 %v889_v19, %v348_v63 }
 0x2cd   :  { %672 = vpow2.f32 %v369_v48  ;;  %v379_v14 = vmul.f32 1.442695, %v366_v0 }
 0x2ce   :  { %674 = vpow2.f32 %v371_v49  ;;  %v368_v59 = vsub.f32 %v897_v24, %v352_v62  ;;  %v381_v16 = vmul.f32 1.442695, %v367_v6 }
 0x2cf   :  { %676 = vpow2.f32 %v315_v50 }
 0x2d0   :  { %678 = vpow2.f32 %v373_v54  ;;  %v383_v18 = vmul.f32 1.442695, %v368_v59 }
 0x2d1   :  { %680 = vpow2.f32 %v375_v58 }
 0x2d2   :  { %682 = vpow2.f32 %v377_v1 }
 0x2d3   :  { %684 = vpow2.f32 %v379_v14 }
 0x2d4   :  { %686 = vpow2.f32 %v381_v16 }
 0x2d5   :  { %688 = vpow2.f32 %v383_v18 }
 0x2d7   :  { %v673_v2 = vpop.eup %672 }
 0x2d8   :  { %v675_v4 = vpop.eup %674  ;;  %396 = vperm.xlu0 %655, %v673_v2  }
 0x2d9   :  { %399 = vperm.xlu1 %654, %v675_v4   ;;  %v919_v15 = vpop.eup %676 }
 0x2da   :  { %v679_v3 = vpop.eup %678 }
 0x2db   :  { %v681_v17 = vpop.eup %680 }
 0x2dc   :  { %468 = vperm.xlu0 %655, %v919_v15   ;;  %v683_v20 = vpop.eup %682 }
 0x2dd   :  { %402 = vperm.xlu1 %654, %v679_v3   ;;  %v685_v19 = vpop.eup %684 }
 0x2de   :  { %v687_v21 = vpop.eup %686 }
 0x2df   :  { %v689_v22 = vpop.eup %688 }
 0x2e1   :  { %405 = vperm.xlu1 %654, %v681_v17  }
 0x2e5   :  { %408 = vperm.xlu1 %654, %v683_v20  }
 0x2e9   :  { %411 = vperm.xlu1 %654, %v685_v19  }
 0x2ed   :  { %414 = vperm.xlu1 %654, %v687_v21  }
 0x2f1   :  { %417 = vperm.xlu1 %654, %v689_v22  }
 0x357   :  { %v397_v23 = vpop.permute.xlu0 %396 }
 0x358   :  { %v400_v25 = vpop.permute.xlu1 %399  ;;  %v480_v26 = vmul.f32 %v397_v23, %v821_v5 }
 0x359   :  { %v481_v24 = vmul.f32 %v400_v25, %v829_v8  ;;  %v426_v46 = vrot.slane %v400_v25, %v871_v61 }
 0x35a   :  { %v488_v27 = vsel %vm53_vm0, %v480_v26, 0.0 }
 0x35b   :  { %v495_v30 = vsel %vm53_vm0, %v481_v24, 0.0  ;;  %v489_v31 = vrot.slane %v488_v27, 4 }
 0x35c   :  { %v403_v28 = vpop.permute.xlu1 %402  ;;  %v496_v35 = vrot.slane %v495_v30, 4 }
 0x35d   :  { %v482_v29 = vmul.f32 %v403_v28, %v833_v10  ;;  %v490_v36 = vadd.f32 %v489_v31, %v488_v27  ;;  %v430_v49 = vrot.slane %v403_v28, %v871_v61 }
 0x35e   :  { %v497_v40 = vadd.f32 %v496_v35, %v495_v30 }
 0x35f   :  { %v502_v32 = vsel %vm53_vm0, %v482_v29, 0.0  ;;  %v491_v41 = vrot.slane %v490_v36, 2 }
 0x360   :  { %v406_v33 = vpop.permute.xlu1 %405  ;;  %v503_v37 = vrot.slane %v502_v32, 4  ;;  %v498_v48 = vrot.slane %v497_v40, 2 }
 0x361   :  { %v483_v34 = vmul.f32 %v406_v33, %v843_v12  ;;  %v422_v12 = vrot.slane %v397_v23, %v871_v61  ;;  %v492_v51 = vadd.f32 %v491_v41, %v490_v36  ;;  %v434_v52 = vrot.slane %v406_v33, %v871_v61 }
 0x362   :  { %v504_v10 = vadd.f32 %v503_v37, %v502_v32  ;;  %v499_v0 = vadd.f32 %v498_v48, %v497_v40 }
 0x363   :  { %v509_v5 = vsel %vm53_vm0, %v483_v34, 0.0  ;;  %v451_v58 = vsel %vm294_vm2, %v426_v46, %v422_v12  ;;  %v493_v62 = vrot.slane %v492_v51, 1  ;;  %v469_v46 = vpop.permute.xlu0 %468 }
 0x364   :  { %v510_v38 = vrot.slane %v509_v5, 4  ;;  %v409_v8 = vpop.permute.xlu1 %408  ;;  %v452_v1 = vsel %vm296_vm3, %v430_v49, %v451_v58  ;;  %v500_v23 = vrot.slane %v499_v0, 1 }
 0x365   :  { %v484_v39 = vmul.f32 %v409_v8, %v825_v7  ;;  %v505_v7 = vrot.slane %v504_v10, 2  ;;  %v438_v55 = vrot.slane %v409_v8, %v871_v61  ;;  %v453_v14 = vsel %vm298_vm4, %v434_v52, %v452_v1 }
 0x366   :  { %v511_v43 = vadd.f32 %v510_v38, %v509_v5  ;;  %v494_v33 = vadd.f32 %v493_v62, %v492_v51 }
 0x367   :  { %v516_v42 = vsel %vm53_vm0, %v484_v39, 0.0  ;;  %v506_v6 = vadd.f32 %v505_v7, %v504_v10  ;;  %v454_v16 = vsel %vm300_vm5, %v438_v55, %v453_v14 }
 0x368   :  { %v517_v44 = vrot.slane %v516_v42, 4  ;;  %v412_v45 = vpop.permute.xlu1 %411  ;;  %v512_v54 = vrot.slane %v511_v43, 2 }
 0x369   :  { %v485_v47 = vmul.f32 %v412_v45, %v831_v9  ;;  %v442_v9 = vrot.slane %v412_v45, %v871_v61  ;;  %v507_v27 = vrot.slane %v506_v6, 1  ;;  %v465_v45 = vld [vmem:[#allocation4] sm:$0xff] }
 0x36a   :  { %v518_v50 = vadd.f32 %v517_v44, %v516_v42  ;;  %v513_v59 = vadd.f32 %v512_v54, %v511_v43  ;;  %v471_v51 = vmul.f32 %v469_v46, %v465_v45  ;;  %v385_v54 = vld [vmem:[#allocation3] sm:$0xff] }
 0x36b   :  { %v523_v53 = vsel %vm53_vm0, %v485_v47, 0.0  ;;  %v455_v22 = vsel %vm302_vm6, %v442_v9, %v454_v16  ;;  %v508_v5 = vadd.f32 %v507_v27, %v506_v6  ;;  %v386_v55 = vmul.f32 %v919_v15, %v385_v54 }
 0x36c   :  { %v524_v56 = vrot.slane %v523_v53, 4  ;;  %v415_v57 = vpop.permute.xlu1 %414  ;;  %v519_v60 = vrot.slane %v518_v50, 2  ;;  %v514_v30 = vrot.slane %v513_v59, 1 }
 0x36d   :  { %v486_v63 = vmul.f32 %v415_v57, %v835_v11  ;;  %v446_v4 = vrot.slane %v415_v57, %v871_v61 }
 0x36e   :  { %v525_v2 = vadd.f32 %v524_v56, %v523_v53  ;;  %v520_v19 = vadd.f32 %v519_v60, %v518_v50  ;;  %v515_v38 = vadd.f32 %v514_v30, %v513_v59 }
 0x36f   :  { %v530_v3 = vsel %vm53_vm0, %v486_v63, 0.0  ;;  %v456_v24 = vsel %vm304_vm7, %v446_v4, %v455_v22 }
 0x370   :  { %v526_v17 = vrot.slane %v525_v2, 2  ;;  %v531_v18 = vrot.slane %v530_v3, 4  ;;  %v418_v20 = vpop.permute.xlu1 %417  ;;  %v521_v34 = vrot.slane %v520_v19, 1 }
 0x371   :  { %v450_v11 = vrot.slane %v418_v20, %v871_v61  ;;  %v487_v21 = vmul.f32 %v418_v20, %v847_v13  ;;  %v501_v13 = vadd.f32 %v500_v23, %v499_v0 }
 0x372   :  { %v527_v25 = vadd.f32 %v526_v17, %v525_v2  ;;  %v532_v26 = vadd.f32 %v531_v18, %v530_v3  ;;  %v522_v40 = vadd.f32 %v521_v34, %v520_v19 }
 0x373   :  { %v537_v28 = vsel %vm53_vm0, %v487_v21, 0.0  ;;  %v457_v29 = vsel %vm306_vm8, %v450_v11, %v456_v24  ;;  %v552_v41 = vsel %vm294_vm2, %v501_v13, %v494_v33 }
 0x374   :  { %v533_v31 = vrot.slane %v532_v26, 2  ;;  %v538_v32 = vrot.slane %v537_v28, 4  ;;  %v459_v61 = vsel %vm309_vm9, %v457_v29, 0.0  ;;  %v528_v35 = vrot.slane %v527_v25, 1 }
 0x375   :  { %460 = vadd.xlane.f32.xlu1 %v459_v61  ;;  %v553_v43 = vsel %vm296_vm3, %v508_v5, %v552_v41 }
 0x376   :  { %v534_v36 = vadd.f32 %v533_v31, %v532_v26  ;;  %v539_v37 = vadd.f32 %v538_v32, %v537_v28  ;;  %v529_v10 = vadd.f32 %v528_v35, %v527_v25  ;;  %v554_v12 = vsel %vm298_vm4, %v515_v38, %v553_v43 }
 0x377   :  { %v555_v48 = vsel %vm300_vm5, %v522_v40, %v554_v12 }
 0x378   :  { %v535_v8 = vrot.slane %v534_v36, 1  ;;  %v540_v39 = vrot.slane %v539_v37, 2  ;;  %v556_v49 = vsel %vm302_vm6, %v529_v10, %v555_v48 }
 0x37a   :  { %v541_v42 = vadd.f32 %v540_v39, %v539_v37  ;;  %v536_v44 = vadd.f32 %v535_v8, %v534_v36 }
 0x37c   :  { %v542_v47 = vrot.slane %v541_v42, 1  ;;  %v557_v7 = vsel %vm304_vm7, %v536_v44, %v556_v49 }
 0x37e   :  { %v543_v50 = vadd.f32 %v542_v47, %v541_v42 }
 0x380   :  { %v558_v52 = vsel %vm306_vm8, %v543_v50, %v557_v7 }
 0x381   :  { %v560_v53 = vadd.f32 %v558_v52, %v471_v51 }
 0x383   :  { %561 = vst.msk [vmem:[#allocation4] sm:$0xff] %vm53_vm0, %v560_v53 }
 0x38a   :  { %v568_v9 = vld [vmem:[#allocation4] sm:$0xff] }
 0x402   :  { %v461_v56 = vpop.xlane.xlu1 %460 }
 0x403   :  { %v462_v57 = vadd.f32 %v461_v56, %v386_v55 }
 0x405   :  { %464 = vst.msk [vmem:[#allocation3] sm:$0xff] %vm50_vm1, %v462_v57 }
 0x40c   :  { %v566_v58 = vld [vmem:[#allocation3] sm:$0xff] }
 0x40d   :  { %690 = vrcp.f32 %v566_v58 }
 0x417   :  { %v691_v60 = vpop.eup %690 }
 0x418   :  { %571 = vperm.xlu0 %655, %v691_v60  }
 0x497   :  { %v572_v63 = vpop.permute.xlu0 %571 }
 0x498   :  { %v574_v0 = vmul.f32 %v572_v63, %v568_v9 }
 0x49a   :  { %575 = vst.msk [vmem:[#allocation10] sm:$0xff] %vm53_vm0, %v574_v0 }
 0x49b   :  { %747 = shalt.err (!%p744_p6)
}
 0x49c   :  { %s748_s20 = scalar_lea.hbm %s982_s4, 128 }
 0x49d   :  { %p749_p7 = scmp.ne.s32.totalorder %s982_s4, %s748_s20  ;;  %p752_p8 = scmp.lt.u32.totalorder %s748_s20, %s982_s4 }
 0x49f   :  { %p754_p9 = pnand %p752_p8, %p749_p7 }
 0x4a1   :  { %757 = shalt.err (!%p754_p9)
}
 0x4a2   :  { %585 = dma.vmem_to_hbm [thread:$0]  %s583_s16, 128, %s982_s4, [#allocation7]  }
 0x4a3   :  { %762 = dma.done.wait [#allocation7], 128  }
 0x4a4   :  { %763 = vsyncadd [#allocation7], 4294967168 }
 0x4a5   :  { %589 = vsyncpa [#allocation6], 1 }
 0x4a6   :  { %590 = vsyncpa [#allocation9], 1 }
 0x4a7   :  { %591 = vsyncpa [#allocation7], 1 }

</bundles_post_ra>
